<compile_context>
chip_gen: v6e
topology: v6e:2x2x1
jax: 0.10.0
libtpu: 0.0.40
codegen_flags: <defaults>
</compile_context>

<pallas_src>
import jax
import jax.numpy as jnp
from jax.experimental import pallas as pl
from jax.experimental.pallas import tpu as pltpu


def _round_up(v, m):
    return ((v + m - 1) // m) * m


def _cdiv(a, b):
    return (a + b - 1) // b


# ----------------------------- kernels --------------------------------------


def _linear_mxu_kernel(x_ref, wt_ref, b_ref, o_ref):
    # x_ref: (tm, tk)   wt_ref: (tk, tn)   b_ref: (1, tn)   o_ref: (tm, tn) f32
    # o_ref's block index ignores the K grid axis, so the tile is VMEM-resident
    # across all K steps and doubles as the f32 accumulator (no scratch).
    @pl.when(pl.program_id(2) == 0)
    def _():
        o_ref[...] = jnp.broadcast_to(b_ref[...], o_ref.shape)

    # Weight is pre-transposed once at prepare time -> no in-kernel .T / XLU.
    o_ref[...] += jnp.dot(
        x_ref[...], wt_ref[...], preferred_element_type=jnp.float32
    )


def _affine_1x1_kernel(x_ref, w_ref, b_ref, o_ref):
    # Degenerate in_dim == out_dim == 1 linear: out = x * w + b (VPU only).
    # w_ref / b_ref are (1, 1) blocks; broadcasting does the rest.
    o_ref[...] = x_ref[...] * w_ref[...] + b_ref[...]


# --------------------------- parameter prep ---------------------------------


def _choose_k_tiling(k_dim, tk_cap):
    """Pick (tk, padded_k). If K fits one tile, use it exactly (zero padding)."""
    if k_dim <= tk_cap:
        return k_dim, k_dim
    n_steps = _cdiv(k_dim, tk_cap)
    tk = _round_up(_cdiv(k_dim, n_steps), 128)
    return tk, tk * n_steps


def prepare_linear_params(weight, bias, *, dtype=jnp.float32, tk_cap=1024):
    """One-time weight/bias prep (hoisted out of the per-call forward path).

    weight: [out_dim, in_dim] (nn.Linear layout)  ->  w_t: [k_p, o_p]
            (transposed to the MXU-friendly [in, out] layout, K padded to the
             K tiling, out dim padded lane-dense to a multiple of 128).
    bias:   [out_dim]                              ->  b2d: [1, o_p] (f32)

    Set dtype=jnp.bfloat16 on v6e/v7x to feed the bf16-native MXU (accumulation
    stays f32 inside the kernel).
    """
    out_dim, k_dim = weight.shape
    _, k_p = _choose_k_tiling(k_dim, tk_cap)
    o_p = _round_up(out_dim, 128)

    w_t = jnp.asarray(weight, dtype=dtype).T                      # [k, out]
    w_t = jnp.pad(w_t, ((0, k_p - k_dim), (0, o_p - out_dim)))
    b2d = jnp.asarray(bias, dtype=jnp.float32).reshape(1, out_dim)
    b2d = jnp.pad(b2d, ((0, 0), (0, o_p - out_dim)))
    return w_t, b2d, out_dim


# ------------------------------ forward -------------------------------------


def _linear_1x1(x, w_t, b2d):
    """VPU-only fast path for the module's degenerate 1x1 linear."""
    n = x.shape[0]
    tm = n if n <= 512 else 512                  # block == full dim, or 512|8
    grid = (_cdiv(n, tm),)
    w11 = w_t[:1, :1].astype(jnp.float32)
    b11 = b2d[:1, :1]
    return pl.pallas_call(
        _affine_1x1_kernel,
        out_shape=jax.ShapeDtypeStruct((n, 1), jnp.float32),
        grid_spec=pltpu.PrefetchScalarGridSpec(
            num_scalar_prefetch=0,
            grid=grid,
            in_specs=[
                pl.BlockSpec((tm, 1), lambda i: (i, 0)),    # x
                pl.BlockSpec((1, 1), lambda i: (0, 0)),     # w scalar
                pl.BlockSpec((1, 1), lambda i: (0, 0)),     # b scalar
            ],
            out_specs=pl.BlockSpec((tm, 1), lambda i: (i, 0)),
        ),
        compiler_params=pltpu.CompilerParams(
            dimension_semantics=("parallel",),
        ),
    )(x.astype(jnp.float32), w11, b11)


def linear_forward(x, w_t, b2d, out_dim, *, tm_cap=512, tn_cap=512,
                   tk_cap=1024, vmem_limit_bytes=32 * 1024 * 1024):
    """out = x @ weight.T + bias, with (w_t, b2d, out_dim) from
    prepare_linear_params().

    x:   [N, in_dim]
    w_t: [k_p, o_p]   pre-transposed / pre-padded weight
    b2d: [1, o_p]     pre-padded bias (f32)
    """
    n, k_dim = x.shape
    k_p, o_p = w_t.shape
    assert b2d.shape == (1, o_p), "bias was not prepared to match the weight"

    # Degenerate 1x1 linear (the module's actual configuration): skip the MXU
    # kernel — padding K/N to 128 would make >99% of the work zeros.
    if k_dim == 1 and out_dim == 1:
        return _linear_1x1(x, w_t, b2d)

    tk, k_p_expected = _choose_k_tiling(k_dim, tk_cap)
    assert k_p == k_p_expected, "w_t was prepared with a different tk_cap"

    # bf16 MXU inputs if the weight was prepared in bf16 (f32 accumulation).
    if x.dtype != w_t.dtype:
        x = x.astype(w_t.dtype)

    # Only the K axis of x ever needs zero padding, and only when K spans
    # multiple tiles (single-tile K uses the full dim as the block size).
    if k_p != k_dim:
        x = jnp.pad(x, ((0, 0), (0, k_p - k_dim)))

    # M tile: multiple of 16 (bf16-safe sublanes); keep >= 2 (M, N) tiles when
    # possible so the parallel axes can split across v7x's two TensorCores.
    if n > tm_cap:
        tm = tm_cap
    elif n >= 32:
        tm = _round_up(_cdiv(n, 2), 16)
    else:
        tm = n                                   # single block == full dim
    tn = min(tn_cap, o_p)                        # multiple of 128

    grid = (_cdiv(n, tm), _cdiv(o_p, tn), k_p // tk)

    flops = 2 * n * o_p * k_p
    bytes_accessed = (x.size * x.dtype.itemsize
                      + w_t.size * w_t.dtype.itemsize
                      + (n * o_p + o_p) * 4)

    out = pl.pallas_call(
        _linear_mxu_kernel,
        out_shape=jax.ShapeDtypeStruct((n, o_p), jnp.float32),
        grid_spec=pltpu.PrefetchScalarGridSpec(
            num_scalar_prefetch=0,
            grid=grid,
            in_specs=[
                pl.BlockSpec((tm, tk), lambda i, j, kk: (i, kk)),   # x
                pl.BlockSpec((tk, tn), lambda i, j, kk: (kk, j)),   # W^T
                pl.BlockSpec((1, tn), lambda i, j, kk: (0, j)),     # bias
            ],
            out_specs=pl.BlockSpec((tm, tn), lambda i, j, kk: (i, j)),
        ),
        compiler_params=pltpu.CompilerParams(
            dimension_semantics=("parallel", "parallel", "arbitrary"),
            # ~10 MiB double-buffered at (512,512,1024) f32; 32 MiB is within
            # the scoped-VMEM budget of v5e (128 MiB phys), v6e (128), v7x (64).
            vmem_limit_bytes=vmem_limit_bytes,
        ),
        cost_estimate=pl.CostEstimate(
            flops=flops, transcendentals=0, bytes_accessed=bytes_accessed),
    )(x, w_t, b2d)

    # M is never padded and K padding never reaches the output; only trim the
    # (weight-side) lane padding of N when out_dim is not a multiple of 128.
    return out if o_p == out_dim else out[:, :out_dim]


# ------------------------------- demo ---------------------------------------

if __name__ == "__main__":
    key = jax.random.PRNGKey(0)
    kw, kb, kx, kw2, kb2 = jax.random.split(key, 5)

    # --- Case 1: the module's own shapes (input_dim=1, output_dim=1, x 5x1) ---
    input_dim, output_dim = 1, 1
    weight = jax.random.normal(kw, (output_dim, input_dim), dtype=jnp.float32)
    bias = jax.random.normal(kb, (output_dim,), dtype=jnp.float32)
    x = jnp.array([[1.5], [2.5], [3.5], [15.2], [50.5]], dtype=jnp.float32)

    w_t, b2d, od = prepare_linear_params(weight, bias)          # one-time prep
    out = jax.block_until_ready(linear_forward(x, w_t, b2d, od))
    ref = x @ weight.T + bias
    assert out.shape == (5, output_dim)
    assert jnp.allclose(out, ref, atol=1e-5, rtol=1e-5)

    # --- Case 2: larger, non-tile-aligned shapes -> tiled MXU grid path ------
    n2, in2, out2 = 300, 160, 130
    x2 = jax.random.normal(kx, (n2, in2), dtype=jnp.float32)
    w2 = jax.random.normal(kw2, (out2, in2), dtype=jnp.float32)
    b2 = jax.random.normal(kb2, (out2,), dtype=jnp.float32)

    w2_t, b2_2d, od2 = prepare_linear_params(w2, b2)
    out2_v = jax.block_until_ready(linear_forward(x2, w2_t, b2_2d, od2))
    ref2 = x2 @ w2.T + b2
    assert out2_v.shape == (n2, out2)
    assert jnp.allclose(out2_v, ref2, atol=1e-4, rtol=1e-4)

    # --- Case 3: bf16 MXU inputs (v6e/v7x fast path), f32 accumulation -------
    w2_t_bf, b2_2d_bf, _ = prepare_linear_params(w2, b2, dtype=jnp.bfloat16)
    out3 = jax.block_until_ready(linear_forward(x2, w2_t_bf, b2_2d_bf, od2))
    ref3 = (x2.astype(jnp.bfloat16).astype(jnp.float32)
            @ w2.astype(jnp.bfloat16).astype(jnp.float32).T) + b2
    assert out3.shape == (n2, out2)
    assert jnp.allclose(out3, ref3, atol=5e-2, rtol=5e-2)

    print("KERNEL_OK")
</pallas_src>

<mosaic_0001>
module attributes {stable_mosaic.version = 11 : i64} {
  func.func @_affine_1x1_kernel(%arg0: i32, %arg1: memref<5x1xf32, #tpu.memory_space<vmem>>, %arg2: memref<1x1xf32, #tpu.memory_space<vmem>>, %arg3: memref<1x1xf32, #tpu.memory_space<vmem>>, %arg4: memref<5x1xf32, #tpu.memory_space<vmem>>) attributes {dimension_semantics = [#tpu.dimension_semantics<parallel>], iteration_bounds = array<i64: 1>, scalar_prefetch = 0 : i64, scratch_operands = 0 : i64, tpu.core_type = #tpu.core_type<tc>, window_params = [{transform_indices = @transform_0, window_bounds = array<i64: 5, 1>}, {pipeline_mode = #tpu.pipeline_mode<synchronous>, transform_indices = @transform_1, window_bounds = array<i64: 1, 1>}, {pipeline_mode = #tpu.pipeline_mode<synchronous>, transform_indices = @transform_2, window_bounds = array<i64: 1, 1>}, {transform_indices = @transform_3, window_bounds = array<i64: 5, 1>}]} {
    %c0 = arith.constant 0 : index
    %c0_0 = arith.constant 0 : index
    %0 = vector.load %arg1[%c0, %c0_0] : memref<5x1xf32, #tpu.memory_space<vmem>>, vector<5x1xf32>
    %c0_1 = arith.constant 0 : index
    %c0_2 = arith.constant 0 : index
    %1 = vector.load %arg2[%c0_1, %c0_2] : memref<1x1xf32, #tpu.memory_space<vmem>>, vector<1x1xf32>
    %2 = vector.broadcast %1 : vector<1x1xf32> to vector<5x1xf32>
    %3 = arith.mulf %0, %2 : vector<5x1xf32>
    %c0_3 = arith.constant 0 : index
    %c0_4 = arith.constant 0 : index
    %4 = vector.load %arg3[%c0_3, %c0_4] : memref<1x1xf32, #tpu.memory_space<vmem>>, vector<1x1xf32>
    %5 = vector.broadcast %4 : vector<1x1xf32> to vector<5x1xf32>
    %6 = arith.addf %3, %5 : vector<5x1xf32>
    %c0_5 = arith.constant 0 : index
    %c0_6 = arith.constant 0 : index
    %7 = vector.load %arg4[%c0_5, %c0_6] : memref<5x1xf32, #tpu.memory_space<vmem>>, vector<5x1xf32>
    tpu.vector_store %arg4[%c0_5, %c0_6], %6 {strides = array<i32>} : memref<5x1xf32, #tpu.memory_space<vmem>>, vector<5x1xf32>,
    return
  }
  func.func @transform_0(%arg0: i32) -> (i32, i32) {
    %c0_i32 = arith.constant 0 : i32
    %c0_i32_0 = arith.constant 0 : i32
    return %arg0, %c0_i32 : i32, i32
  }
  func.func @transform_1(%arg0: i32) -> (i32, i32) {
    %c0_i32 = arith.constant 0 : i32
    %c0_i32_0 = arith.constant 0 : i32
    %c0_i32_1 = arith.constant 0 : i32
    return %c0_i32, %c0_i32_0 : i32, i32
  }
  func.func @transform_2(%arg0: i32) -> (i32, i32) {
    %c0_i32 = arith.constant 0 : i32
    %c0_i32_0 = arith.constant 0 : i32
    %c0_i32_1 = arith.constant 0 : i32
    return %c0_i32, %c0_i32_0 : i32, i32
  }
  func.func @transform_3(%arg0: i32) -> (i32, i32) {
    %c0_i32 = arith.constant 0 : i32
    %c0_i32_0 = arith.constant 0 : i32
    return %arg0, %c0_i32 : i32, i32
  }
}

</mosaic_0001>

<bundles_post_ra>
// kernel: tpu_custom_call.1
= control target key start
LH: loop header
LB: loop body
LE: loop exit
PB: predicated region body
PF: predicated region fallthrough
CT: control target
= control target key end

     0   :  { %vm35_vm0 = vcmask 4096   ;;  %s75_s1 = inlined_call_operand.<no memory space> [shape: f32[1,1], index: 1, kind: input, shape index: {}]   ;;  %s76_s2 = inlined_call_operand.<no memory space> [shape: f32[1,1], index: 2, kind: input, shape index: {}]   ;;  %s77_s0 = inlined_call_operand.vmem [shape: f32[5,1], index: 0, kind: input, shape index: {}]   ;;  %s78_s3 = inlined_call_operand.vmem [shape: f32[5,1], index: 3, kind: output, shape index: {}]  }
   0x1   :  { %v8_v0 = vstv %s75_s1  ;;  %v10_v1 = vstv %s76_s2  ;;  %v18_v2 = vld [vmem:[%s77_s0] sm:$0x1f] }
   0x2   :  { %9 = vst [vmem:[#allocation2] sm:$0x1] %v8_v0  ;;  %11 = vst [vmem:[#allocation3] sm:$0x1] %v10_v1 }
   0x9   :  { %v41_v3 = vld [vmem:[#allocation2] ss:$0 sm:$0xff]  ;;  %v42_v4 = vld [vmem:[#allocation3] ss:$0 sm:$0xff] }
   0xa   :  { %v26_v5 = vmul.f32 %v41_v3, %v18_v2 }
   0xc   :  { %v34_v6 = vadd.f32 %v42_v4, %v26_v5 }
   0xe   :  { %36 = vst.msk [vmem:[%s78_s3] sm:$0x1f] %vm35_vm0, %v34_v6 }

</bundles_post_ra>
